<compile_context>
chip_gen: v7x
topology: tpu7x:2x2x1
jax: 0.10.0
libtpu: 0.0.40
codegen_flags: <defaults>
</compile_context>

<pallas_src>
import numpy as np
import jax
import jax.numpy as jnp
from jax import lax
from jax.experimental import pallas as pl
from jax.experimental.pallas import tpu as pltpu

SELU_ALPHA = 1.6732632423543772
SELU_SCALE = 1.0507009873554805
BN_EPS = 1e-5        # nn.BatchNorm1d default eps
NORM_EPS = 1e-12     # F.normalize default eps
NUM_AGENTS = 11


# ---------------------------------------------------------------------------
# shared math (pure jnp -> usable inside the kernel and in the JAX reference)
# ---------------------------------------------------------------------------
def _selu(x):
    return SELU_SCALE * jnp.where(x > 0, x, SELU_ALPHA * (jnp.exp(x) - 1.0))


def _batchnorm_train(x, gamma, beta):
    # train-mode BatchNorm1d: batch mean + biased batch variance
    mean = jnp.mean(x, axis=0, keepdims=True)
    var = jnp.mean((x - mean) ** 2, axis=0, keepdims=True)
    return (x - mean) * lax.rsqrt(var + BN_EPS) * gamma + beta


# ---------------------------------------------------------------------------
# Fused kernel: masked avg-pool + L2-normalize + 3-layer MLP (train-mode BN, SELU)
# One grid step == one contrastive half.
# ---------------------------------------------------------------------------
def _fused_kernel(state_ref, pmat_ref,
                  w1_ref, b1_ref, g1_ref, be1_ref,
                  w2_ref, b2_ref, g2_ref, be2_ref,
                  w3_ref, b3_ref, out_ref):
    # state_ref: (split*11, T, F) rows of this half
    # pmat_ref : (1, split, split*11) block-diag (team-mask * 1/(11*T)) pool operator
    x = state_ref[...].astype(jnp.float32)
    ts = jnp.sum(x, axis=1)                                        # (split*11, F) time sum
    pooled = jnp.dot(pmat_ref[0], ts,
                     preferred_element_type=jnp.float32)           # (split, F) MXU pool

    # F.normalize(dim=1): x / max(||x||, eps)  ==  x * rsqrt(max(||x||^2, eps^2))
    sumsq = jnp.sum(pooled * pooled, axis=1, keepdims=True)
    z = pooled * lax.rsqrt(jnp.maximum(sumsq, NORM_EPS * NORM_EPS))

    h = jnp.dot(z, w1_ref[...], preferred_element_type=jnp.float32) + b1_ref[...]
    h = _selu(_batchnorm_train(h, g1_ref[...], be1_ref[...]))
    h = jnp.dot(h, w2_ref[...], preferred_element_type=jnp.float32) + b2_ref[...]
    h = _selu(_batchnorm_train(h, g2_ref[...], be2_ref[...]))
    out_ref[0] = jnp.dot(h, w3_ref[...], preferred_element_type=jnp.float32) + b3_ref[...]


def _const_spec(shape):
    # Same block for both halves -> weight stays resident in VMEM across the grid.
    nd = len(shape)
    return pl.BlockSpec(shape, lambda h, _nd=nd: (0,) * _nd)


# ---------------------------------------------------------------------------
# Wrapper: one pallas_call for the whole Decoder_CL forward
# ---------------------------------------------------------------------------
def decoder_cl_forward(state_feat, team_ids, params, time_steps, feature_dim,
                       *, pool_dtype=jnp.float32):
    """state_feat: (N*11, T, F); team_ids: (N*11,). Returns (x, y), each (N//2, out_dim)."""
    A = NUM_AGENTS
    total = state_feat.shape[0]
    assert total % A == 0, "leading dim must be a multiple of 11 agents"
    N = total // A
    assert N % 2 == 0, "contrastive decoder expects an even number of agent groups"
    split = N // 2
    T, F = time_steps, feature_dim
    Do = params["w3"].shape[1]

    # Team mask with the 1/(11*T) avg-pool factor folded in, expanded into a
    # per-half block-diagonal pooling operator (tiny, built once in plain JAX).
    inv = 1.0 / (A * T)
    mask = jnp.where((team_ids == 0) | (team_ids == 1), inv, 0.0).astype(jnp.float32)
    m2 = mask.reshape(2, split, A)                                  # (2, split, 11)
    eye = jnp.eye(split, dtype=jnp.float32)
    pmat = jnp.einsum("st,hta->hsta", eye, m2).reshape(2, split, split * A)

    # pool_dtype=jnp.bfloat16 halves the pool-stage HBM traffic (mainly a v5e/v6e
    # win); the kernel accumulates in f32 either way.  Default keeps f32 numerics.
    state = state_feat.astype(pool_dtype)                           # (N*11, T, F)

    weight_keys = ("w1", "b1", "g1", "be1", "w2", "b2", "g2", "be2", "w3", "b3")
    weights = [params[k] for k in weight_keys]

    in_specs = [
        pl.BlockSpec((split * A, T, F), lambda h: (h, 0, 0)),       # per-half state slab
        pl.BlockSpec((1, split, split * A), lambda h: (h, 0, 0)),   # per-half pool operator
    ] + [_const_spec(w.shape) for w in weights]                     # resident weights
    out_specs = pl.BlockSpec((1, split, Do), lambda h: (h, 0, 0))

    # Rough VMEM budget (double-buffered state slab + resident weights + headroom),
    # clamped so it is valid on v5e/v6e (128 MiB) and v7x (64 MiB physical).
    # TODO(synk): for very large split*T*F the state pool should move to a K-tiled
    # reduction grid axis with an f32 VMEM accumulator instead of one full slab.
    block_bytes = (
        split * A * T * F * jnp.dtype(pool_dtype).itemsize
        + 2 * split * split * A * 4
        + sum(int(w.size) * w.dtype.itemsize for w in weights)
        + split * Do * 4
    )
    vmem_limit = int(min(max(4 * block_bytes, 16 * 2 ** 20), 48 * 2 ** 20))

    out = pl.pallas_call(
        _fused_kernel,
        out_shape=jax.ShapeDtypeStruct((2, split, Do), jnp.float32),
        grid=(2,),
        in_specs=in_specs,
        out_specs=out_specs,
        compiler_params=pltpu.CompilerParams(
            dimension_semantics=("parallel",),
            vmem_limit_bytes=vmem_limit,
        ),
    )(state, pmat, *weights)
    return out[0], out[1]


# ---------------------------------------------------------------------------
# pure-JAX reference for correctness checking (mirrors the PyTorch module)
# ---------------------------------------------------------------------------
def reference_forward(state_feat, team_ids, params, time_steps, feature_dim):
    mask = ((team_ids == 0) | (team_ids == 1)).astype(jnp.float32)
    h = state_feat.astype(jnp.float32) * mask[:, None, None]
    N = state_feat.shape[0] // NUM_AGENTS
    h = h.reshape(N, NUM_AGENTS, time_steps, feature_dim)
    pooled = jnp.mean(h, axis=(1, 2))                               # avg over (11, T)
    split = N // 2

    def l2n(v):
        nrm = jnp.sqrt(jnp.sum(v * v, axis=1, keepdims=True))
        return v / jnp.maximum(nrm, NORM_EPS)

    def mlp(v):
        z = l2n(v)
        a = jnp.dot(z, params["w1"]) + params["b1"]
        a = _selu(_batchnorm_train(a, params["g1"], params["be1"]))
        a = jnp.dot(a, params["w2"]) + params["b2"]
        a = _selu(_batchnorm_train(a, params["g2"], params["be2"]))
        return jnp.dot(a, params["w3"]) + params["b3"]

    return mlp(pooled[:split]), mlp(pooled[split:])


def init_params(key, feature_dim, out_dim):
    ks = jax.random.split(key, 3)

    def linear(k, fan_in, fan_out):
        bound = 1.0 / np.sqrt(fan_in)
        kw, kb = jax.random.split(k)
        w = jax.random.uniform(kw, (fan_in, fan_out), jnp.float32, -bound, bound)
        b = jax.random.uniform(kb, (1, fan_out), jnp.float32, -bound, bound)
        return w, b

    w1, b1 = linear(ks[0], feature_dim, 2 * feature_dim)
    w2, b2 = linear(ks[1], 2 * feature_dim, feature_dim)
    w3, b3 = linear(ks[2], feature_dim, out_dim)
    return dict(
        w1=w1, b1=b1,
        g1=jnp.ones((1, 2 * feature_dim), jnp.float32),
        be1=jnp.zeros((1, 2 * feature_dim), jnp.float32),
        w2=w2, b2=b2,
        g2=jnp.ones((1, feature_dim), jnp.float32),
        be2=jnp.zeros((1, feature_dim), jnp.float32),
        w3=w3, b3=b3,
    )


if __name__ == "__main__":
    # Small shapes consistent with the module: time_steps=8, feature_dim=32, out_dim=16,
    # 4 groups of 11 agents (two halves of 2 groups for the contrastive branches).
    T, F, DO = 8, 32, 16
    N_GROUPS = 4

    key = jax.random.PRNGKey(0)
    k_state, k_team, k_param = jax.random.split(key, 3)
    state_feat = jax.random.normal(k_state, (N_GROUPS * NUM_AGENTS, T, F), jnp.float32)
    team_ids = jax.random.randint(k_team, (N_GROUPS * NUM_AGENTS,), 0, 3)
    params = init_params(k_param, F, DO)

    x, y = decoder_cl_forward(state_feat, team_ids, params, T, F)
    jax.block_until_ready((x, y))

    xr, yr = reference_forward(state_feat, team_ids, params, T, F)
    np.testing.assert_allclose(np.asarray(x), np.asarray(xr), rtol=1e-3, atol=1e-3)
    np.testing.assert_allclose(np.asarray(y), np.asarray(yr), rtol=1e-3, atol=1e-3)
    print("KERNEL_OK")
</pallas_src>

<mosaic_0001>
module attributes {stable_mosaic.version = 11 : i64} {
  func.func @_fused_kernel(%arg0: i32, %arg1: memref<22x8x32xf32, #tpu.memory_space<vmem>>, %arg2: memref<1x2x22xf32, #tpu.memory_space<vmem>>, %arg3: memref<32x64xf32, #tpu.memory_space<vmem>>, %arg4: memref<1x64xf32, #tpu.memory_space<vmem>>, %arg5: memref<1x64xf32, #tpu.memory_space<vmem>>, %arg6: memref<1x64xf32, #tpu.memory_space<vmem>>, %arg7: memref<64x32xf32, #tpu.memory_space<vmem>>, %arg8: memref<1x32xf32, #tpu.memory_space<vmem>>, %arg9: memref<1x32xf32, #tpu.memory_space<vmem>>, %arg10: memref<1x32xf32, #tpu.memory_space<vmem>>, %arg11: memref<32x16xf32, #tpu.memory_space<vmem>>, %arg12: memref<1x16xf32, #tpu.memory_space<vmem>>, %arg13: memref<1x2x16xf32, #tpu.memory_space<vmem>>) attributes {dimension_semantics = [#tpu.dimension_semantics<parallel>], iteration_bounds = array<i64: 2>, scalar_prefetch = 0 : i64, scratch_operands = 0 : i64, tpu.core_type = #tpu.core_type<tc>, window_params = [{transform_indices = @transform_0, window_bounds = array<i64: 22, 8, 32>}, {transform_indices = @transform_1, window_bounds = array<i64: 1, 2, 22>}, {pipeline_mode = #tpu.pipeline_mode<synchronous>, transform_indices = @transform_2, window_bounds = array<i64: 32, 64>}, {pipeline_mode = #tpu.pipeline_mode<synchronous>, transform_indices = @transform_3, window_bounds = array<i64: 1, 64>}, {pipeline_mode = #tpu.pipeline_mode<synchronous>, transform_indices = @transform_4, window_bounds = array<i64: 1, 64>}, {pipeline_mode = #tpu.pipeline_mode<synchronous>, transform_indices = @transform_5, window_bounds = array<i64: 1, 64>}, {pipeline_mode = #tpu.pipeline_mode<synchronous>, transform_indices = @transform_6, window_bounds = array<i64: 64, 32>}, {pipeline_mode = #tpu.pipeline_mode<synchronous>, transform_indices = @transform_7, window_bounds = array<i64: 1, 32>}, {pipeline_mode = #tpu.pipeline_mode<synchronous>, transform_indices = @transform_8, window_bounds = array<i64: 1, 32>}, {pipeline_mode = #tpu.pipeline_mode<synchronous>, transform_indices = @transform_9, window_bounds = array<i64: 1, 32>}, {pipeline_mode = #tpu.pipeline_mode<synchronous>, transform_indices = @transform_10, window_bounds = array<i64: 32, 16>}, {pipeline_mode = #tpu.pipeline_mode<synchronous>, transform_indices = @transform_11, window_bounds = array<i64: 1, 16>}, {transform_indices = @transform_12, window_bounds = array<i64: 1, 2, 16>}]} {
    %c0 = arith.constant 0 : index
    %c0_0 = arith.constant 0 : index
    %c0_1 = arith.constant 0 : index
    %0 = vector.load %arg1[%c0, %c0_0, %c0_1] : memref<22x8x32xf32, #tpu.memory_space<vmem>>, vector<22x8x32xf32>
    %cst = arith.constant dense<0.000000e+00> : vector<22x32xf32>
    %1 = vector.multi_reduction <add>, %0, %cst [1] : vector<22x8x32xf32> to vector<22x32xf32>
    %c0_2 = arith.constant 0 : index
    %c0_3 = arith.constant 0 : index
    %c0_4 = arith.constant 0 : index
    %2 = vector.load %arg2[%c0_2, %c0_3, %c0_4] : memref<1x2x22xf32, #tpu.memory_space<vmem>>, vector<1x2x22xf32>
    %3 = vector.shape_cast %2 : vector<1x2x22xf32> to vector<2x22xf32>
    %cst_5 = arith.constant dense<0.000000e+00> : vector<2x32xf32>
    %4 = tpu.matmul %3, %1, %cst_5 {dimension_numbers = #tpu.dot_dimension_numbers<[1], [0], [0], [1], [0, 0, 1, 1], [], []>} : vector<2x22xf32>, vector<22x32xf32>, vector<2x32xf32> -> vector<2x32xf32>
    %5 = arith.mulf %4, %4 : vector<2x32xf32>
    %cst_6 = arith.constant dense<0.000000e+00> : vector<2xf32>
    %6 = vector.multi_reduction <add>, %5, %cst_6 [1] : vector<2x32xf32> to vector<2xf32>
    %7 = vector.shape_cast %6 : vector<2xf32> to vector<2x1xf32>
    %cst_7 = arith.constant 1.000000e-24 : f32
    %8 = vector.broadcast %cst_7 : f32 to vector<2x1xf32>
    %9 = arith.maximumf %7, %8 : vector<2x1xf32>
    %10 = math.rsqrt %9 : vector<2x1xf32>
    %11 = vector.broadcast %10 : vector<2x1xf32> to vector<2x32xf32>
    %12 = arith.mulf %4, %11 : vector<2x32xf32>
    %c0_8 = arith.constant 0 : index
    %c0_9 = arith.constant 0 : index
    %13 = vector.load %arg3[%c0_8, %c0_9] : memref<32x64xf32, #tpu.memory_space<vmem>>, vector<32x64xf32>
    %cst_10 = arith.constant dense<0.000000e+00> : vector<2x64xf32>
    %14 = tpu.matmul %12, %13, %cst_10 {dimension_numbers = #tpu.dot_dimension_numbers<[1], [0], [0], [1], [0, 0, 1, 1], [], []>} : vector<2x32xf32>, vector<32x64xf32>, vector<2x64xf32> -> vector<2x64xf32>
    %c0_11 = arith.constant 0 : index
    %c0_12 = arith.constant 0 : index
    %15 = vector.load %arg4[%c0_11, %c0_12] : memref<1x64xf32, #tpu.memory_space<vmem>>, vector<1x64xf32>
    %16 = vector.broadcast %15 : vector<1x64xf32> to vector<2x64xf32>
    %17 = arith.addf %14, %16 : vector<2x64xf32>
    %c0_13 = arith.constant 0 : index
    %c0_14 = arith.constant 0 : index
    %18 = vector.load %arg5[%c0_13, %c0_14] : memref<1x64xf32, #tpu.memory_space<vmem>>, vector<1x64xf32>
    %c0_15 = arith.constant 0 : index
    %c0_16 = arith.constant 0 : index
    %19 = vector.load %arg6[%c0_15, %c0_16] : memref<1x64xf32, #tpu.memory_space<vmem>>, vector<1x64xf32>
    %cst_17 = arith.constant dense<0.000000e+00> : vector<64xf32>
    %20 = vector.multi_reduction <add>, %17, %cst_17 [0] : vector<2x64xf32> to vector<64xf32>
    %21 = vector.shape_cast %20 : vector<64xf32> to vector<1x64xf32>
    %cst_18 = arith.constant 2.000000e+00 : f32
    %22 = vector.broadcast %cst_18 : f32 to vector<1x64xf32>
    %23 = arith.divf %21, %22 : vector<1x64xf32>
    %24 = vector.broadcast %23 : vector<1x64xf32> to vector<2x64xf32>
    %25 = arith.subf %17, %24 : vector<2x64xf32>
    %26 = arith.mulf %25, %25 : vector<2x64xf32>
    %cst_19 = arith.constant dense<0.000000e+00> : vector<64xf32>
    %27 = vector.multi_reduction <add>, %26, %cst_19 [0] : vector<2x64xf32> to vector<64xf32>
    %28 = vector.shape_cast %27 : vector<64xf32> to vector<1x64xf32>
    %cst_20 = arith.constant 2.000000e+00 : f32
    %29 = vector.broadcast %cst_20 : f32 to vector<1x64xf32>
    %30 = arith.divf %28, %29 : vector<1x64xf32>
    %31 = vector.broadcast %23 : vector<1x64xf32> to vector<2x64xf32>
    %32 = arith.subf %17, %31 : vector<2x64xf32>
    %cst_21 = arith.constant 9.99999974E-6 : f32
    %33 = vector.broadcast %cst_21 : f32 to vector<1x64xf32>
    %34 = arith.addf %30, %33 : vector<1x64xf32>
    %35 = math.rsqrt %34 : vector<1x64xf32>
    %36 = vector.broadcast %35 : vector<1x64xf32> to vector<2x64xf32>
    %37 = arith.mulf %32, %36 : vector<2x64xf32>
    %38 = vector.broadcast %18 : vector<1x64xf32> to vector<2x64xf32>
    %39 = arith.mulf %37, %38 : vector<2x64xf32>
    %40 = vector.broadcast %19 : vector<1x64xf32> to vector<2x64xf32>
    %41 = arith.addf %39, %40 : vector<2x64xf32>
    %cst_22 = arith.constant 0.000000e+00 : f32
    %42 = vector.broadcast %cst_22 : f32 to vector<2x64xf32>
    %43 = arith.cmpf ogt, %41, %42 : vector<2x64xf32>
    %44 = math.exp %41 : vector<2x64xf32>
    %cst_23 = arith.constant 1.000000e+00 : f32
    %45 = vector.broadcast %cst_23 : f32 to vector<2x64xf32>
    %46 = arith.subf %44, %45 : vector<2x64xf32>
    %cst_24 = arith.constant 1.67326319 : f32
    %47 = vector.broadcast %cst_24 : f32 to vector<2x64xf32>
    %48 = arith.mulf %47, %46 : vector<2x64xf32>
    %49 = arith.select %43, %41, %48 : vector<2x64xi1>, vector<2x64xf32>
    %cst_25 = arith.constant 1.05070102 : f32
    %50 = vector.broadcast %cst_25 : f32 to vector<2x64xf32>
    %51 = arith.mulf %50, %49 : vector<2x64xf32>
    %c0_26 = arith.constant 0 : index
    %c0_27 = arith.constant 0 : index
    %52 = vector.load %arg7[%c0_26, %c0_27] : memref<64x32xf32, #tpu.memory_space<vmem>>, vector<64x32xf32>
    %cst_28 = arith.constant dense<0.000000e+00> : vector<2x32xf32>
    %53 = tpu.matmul %51, %52, %cst_28 {dimension_numbers = #tpu.dot_dimension_numbers<[1], [0], [0], [1], [0, 0, 1, 1], [], []>} : vector<2x64xf32>, vector<64x32xf32>, vector<2x32xf32> -> vector<2x32xf32>
    %c0_29 = arith.constant 0 : index
    %c0_30 = arith.constant 0 : index
    %54 = vector.load %arg8[%c0_29, %c0_30] : memref<1x32xf32, #tpu.memory_space<vmem>>, vector<1x32xf32>
    %55 = vector.broadcast %54 : vector<1x32xf32> to vector<2x32xf32>
    %56 = arith.addf %53, %55 : vector<2x32xf32>
    %c0_31 = arith.constant 0 : index
    %c0_32 = arith.constant 0 : index
    %57 = vector.load %arg9[%c0_31, %c0_32] : memref<1x32xf32, #tpu.memory_space<vmem>>, vector<1x32xf32>
    %c0_33 = arith.constant 0 : index
    %c0_34 = arith.constant 0 : index
    %58 = vector.load %arg10[%c0_33, %c0_34] : memref<1x32xf32, #tpu.memory_space<vmem>>, vector<1x32xf32>
    %cst_35 = arith.constant dense<0.000000e+00> : vector<32xf32>
    %59 = vector.multi_reduction <add>, %56, %cst_35 [0] : vector<2x32xf32> to vector<32xf32>
    %60 = vector.shape_cast %59 : vector<32xf32> to vector<1x32xf32>
    %cst_36 = arith.constant 2.000000e+00 : f32
    %61 = vector.broadcast %cst_36 : f32 to vector<1x32xf32>
    %62 = arith.divf %60, %61 : vector<1x32xf32>
    %63 = vector.broadcast %62 : vector<1x32xf32> to vector<2x32xf32>
    %64 = arith.subf %56, %63 : vector<2x32xf32>
    %65 = arith.mulf %64, %64 : vector<2x32xf32>
    %cst_37 = arith.constant dense<0.000000e+00> : vector<32xf32>
    %66 = vector.multi_reduction <add>, %65, %cst_37 [0] : vector<2x32xf32> to vector<32xf32>
    %67 = vector.shape_cast %66 : vector<32xf32> to vector<1x32xf32>
    %cst_38 = arith.constant 2.000000e+00 : f32
    %68 = vector.broadcast %cst_38 : f32 to vector<1x32xf32>
    %69 = arith.divf %67, %68 : vector<1x32xf32>
    %70 = vector.broadcast %62 : vector<1x32xf32> to vector<2x32xf32>
    %71 = arith.subf %56, %70 : vector<2x32xf32>
    %cst_39 = arith.constant 9.99999974E-6 : f32
    %72 = vector.broadcast %cst_39 : f32 to vector<1x32xf32>
    %73 = arith.addf %69, %72 : vector<1x32xf32>
    %74 = math.rsqrt %73 : vector<1x32xf32>
    %75 = vector.broadcast %74 : vector<1x32xf32> to vector<2x32xf32>
    %76 = arith.mulf %71, %75 : vector<2x32xf32>
    %77 = vector.broadcast %57 : vector<1x32xf32> to vector<2x32xf32>
    %78 = arith.mulf %76, %77 : vector<2x32xf32>
    %79 = vector.broadcast %58 : vector<1x32xf32> to vector<2x32xf32>
    %80 = arith.addf %78, %79 : vector<2x32xf32>
    %cst_40 = arith.constant 0.000000e+00 : f32
    %81 = vector.broadcast %cst_40 : f32 to vector<2x32xf32>
    %82 = arith.cmpf ogt, %80, %81 : vector<2x32xf32>
    %83 = math.exp %80 : vector<2x32xf32>
    %cst_41 = arith.constant 1.000000e+00 : f32
    %84 = vector.broadcast %cst_41 : f32 to vector<2x32xf32>
    %85 = arith.subf %83, %84 : vector<2x32xf32>
    %cst_42 = arith.constant 1.67326319 : f32
    %86 = vector.broadcast %cst_42 : f32 to vector<2x32xf32>
    %87 = arith.mulf %86, %85 : vector<2x32xf32>
    %88 = arith.select %82, %80, %87 : vector<2x32xi1>, vector<2x32xf32>
    %cst_43 = arith.constant 1.05070102 : f32
    %89 = vector.broadcast %cst_43 : f32 to vector<2x32xf32>
    %90 = arith.mulf %89, %88 : vector<2x32xf32>
    %c0_44 = arith.constant 0 : index
    %c0_45 = arith.constant 0 : index
    %91 = vector.load %arg11[%c0_44, %c0_45] : memref<32x16xf32, #tpu.memory_space<vmem>>, vector<32x16xf32>
    %cst_46 = arith.constant dense<0.000000e+00> : vector<2x16xf32>
    %92 = tpu.matmul %90, %91, %cst_46 {dimension_numbers = #tpu.dot_dimension_numbers<[1], [0], [0], [1], [0, 0, 1, 1], [], []>} : vector<2x32xf32>, vector<32x16xf32>, vector<2x16xf32> -> vector<2x16xf32>
    %c0_47 = arith.constant 0 : index
    %c0_48 = arith.constant 0 : index
    %93 = vector.load %arg12[%c0_47, %c0_48] : memref<1x16xf32, #tpu.memory_space<vmem>>, vector<1x16xf32>
    %94 = vector.broadcast %93 : vector<1x16xf32> to vector<2x16xf32>
    %95 = arith.addf %92, %94 : vector<2x16xf32>
    %c0_49 = arith.constant 0 : index
    %c0_50 = arith.constant 0 : index
    %c0_51 = arith.constant 0 : index
    %96 = vector.load %arg13[%c0_49, %c0_50, %c0_51] : memref<1x2x16xf32, #tpu.memory_space<vmem>>, vector<1x2x16xf32>
    %97 = vector.shape_cast %96 : vector<1x2x16xf32> to vector<2x16xf32>
    %98 = vector.shape_cast %95 : vector<2x16xf32> to vector<1x2x16xf32>
    tpu.vector_store %arg13[%c0_49, %c0_50, %c0_51], %98 {strides = array<i32>} : memref<1x2x16xf32, #tpu.memory_space<vmem>>, vector<1x2x16xf32>,
    return
  }
  func.func @transform_0(%arg0: i32) -> (i32, i32, i32) {
    %c0_i32 = arith.constant 0 : i32
    %c0_i32_0 = arith.constant 0 : i32
    %c0_i32_1 = arith.constant 0 : i32
    return %arg0, %c0_i32, %c0_i32_0 : i32, i32, i32
  }
  func.func @transform_1(%arg0: i32) -> (i32, i32, i32) {
    %c0_i32 = arith.constant 0 : i32
    %c0_i32_0 = arith.constant 0 : i32
    %c0_i32_1 = arith.constant 0 : i32
    return %arg0, %c0_i32, %c0_i32_0 : i32, i32, i32
  }
  func.func @transform_2(%arg0: i32) -> (i32, i32) {
    %c0_i32 = arith.constant 0 : i32
    %c0_i32_0 = arith.constant 0 : i32
    %c0_i32_1 = arith.constant 0 : i32
    return %c0_i32, %c0_i32_0 : i32, i32
  }
  func.func @transform_3(%arg0: i32) -> (i32, i32) {
    %c0_i32 = arith.constant 0 : i32
    %c0_i32_0 = arith.constant 0 : i32
    %c0_i32_1 = arith.constant 0 : i32
    return %c0_i32, %c0_i32_0 : i32, i32
  }
  func.func @transform_4(%arg0: i32) -> (i32, i32) {
    %c0_i32 = arith.constant 0 : i32
    %c0_i32_0 = arith.constant 0 : i32
    %c0_i32_1 = arith.constant 0 : i32
    return %c0_i32, %c0_i32_0 : i32, i32
  }
  func.func @transform_5(%arg0: i32) -> (i32, i32) {
    %c0_i32 = arith.constant 0 : i32
    %c0_i32_0 = arith.constant 0 : i32
    %c0_i32_1 = arith.constant 0 : i32
    return %c0_i32, %c0_i32_0 : i32, i32
  }
  func.func @transform_6(%arg0: i32) -> (i32, i32) {
    %c0_i32 = arith.constant 0 : i32
    %c0_i32_0 = arith.constant 0 : i32
    %c0_i32_1 = arith.constant 0 : i32
    return %c0_i32, %c0_i32_0 : i32, i32
  }
  func.func @transform_7(%arg0: i32) -> (i32, i32) {
    %c0_i32 = arith.constant 0 : i32
    %c0_i32_0 = arith.constant 0 : i32
    %c0_i32_1 = arith.constant 0 : i32
    return %c0_i32, %c0_i32_0 : i32, i32
  }
  func.func @transform_8(%arg0: i32) -> (i32, i32) {
    %c0_i32 = arith.constant 0 : i32
    %c0_i32_0 = arith.constant 0 : i32
    %c0_i32_1 = arith.constant 0 : i32
    return %c0_i32, %c0_i32_0 : i32, i32
  }
  func.func @transform_9(%arg0: i32) -> (i32, i32) {
    %c0_i32 = arith.constant 0 : i32
    %c0_i32_0 = arith.constant 0 : i32
    %c0_i32_1 = arith.constant 0 : i32
    return %c0_i32, %c0_i32_0 : i32, i32
  }
  func.func @transform_10(%arg0: i32) -> (i32, i32) {
    %c0_i32 = arith.constant 0 : i32
    %c0_i32_0 = arith.constant 0 : i32
    %c0_i32_1 = arith.constant 0 : i32
    return %c0_i32, %c0_i32_0 : i32, i32
  }
  func.func @transform_11(%arg0: i32) -> (i32, i32) {
    %c0_i32 = arith.constant 0 : i32
    %c0_i32_0 = arith.constant 0 : i32
    %c0_i32_1 = arith.constant 0 : i32
    return %c0_i32, %c0_i32_0 : i32, i32
  }
  func.func @transform_12(%arg0: i32) -> (i32, i32, i32) {
    %c0_i32 = arith.constant 0 : i32
    %c0_i32_0 = arith.constant 0 : i32
    %c0_i32_1 = arith.constant 0 : i32
    return %arg0, %c0_i32, %c0_i32_0 : i32, i32, i32
  }
}

</mosaic_0001>

<bundles_post_ra>
// kernel: tpu_custom_call.1
= control target key start
LH: loop header
LB: loop body
LE: loop exit
PB: predicated region body
PF: predicated region fallthrough
CT: control target
= control target key end

     0   :  { %s1775_s0 = inlined_call_operand.vmem [shape: f32[44,8,32], index: 0, kind: input, shape index: {}]   ;;  %s1776_s1 = inlined_call_operand.vmem [shape: f32[2,2,22], index: 1, kind: input, shape index: {}]   ;;  %s1777_s2 = inlined_call_operand.vmem [shape: f32[32,64], index: 2, kind: input, shape index: {}]   ;;  %s1778_s3 = inlined_call_operand.vmem [shape: f32[1,64], index: 3, kind: input, shape index: {}]   ;;  %s1779_s4 = inlined_call_operand.vmem [shape: f32[1,64], index: 4, kind: input, shape index: {}]   ;;  %s1780_s5 = inlined_call_operand.vmem [shape: f32[1,64], index: 5, kind: input, shape index: {}]   ;;  %s1781_s6 = inlined_call_operand.vmem [shape: f32[64,32], index: 6, kind: input, shape index: {}]   ;;  %s1782_s7 = inlined_call_operand.vmem [shape: f32[1,32], index: 7, kind: input, shape index: {}]   ;;  %s1783_s8 = inlined_call_operand.vmem [shape: f32[1,32], index: 8, kind: input, shape index: {}]   ;;  %s1784_s9 = inlined_call_operand.vmem [shape: f32[1,32], index: 9, kind: input, shape index: {}]   ;;  %s1785_s10 = inlined_call_operand.vmem [shape: f32[32,16], index: 10, kind: input, shape index: {}]   ;;  %s1786_s11 = inlined_call_operand.vmem [shape: f32[1,16], index: 11, kind: input, shape index: {}]   ;;  %s1787_s12 = inlined_call_operand.hbm [shape: f32[2,2,16], index: 12, kind: output, shape index: {}]  }
   0x1   :  { %1788 = sst [smem:[#allocation5_spill]] %s1775_s0 }
   0x2   :  { %1789 = sst [smem:[#allocation6_spill]] %s1776_s1 }
   0x3   :  { %17 = vsyncpa [#allocation3], 0 }
   0x4   :  { %19 = vsyncpa [#allocation3 + $0x1], 0  ;;  %s1488_s21 = smov 0   ;;  %s1490_s22 = smov 0  }
   0x5   :  { %s1492_s23 = smov 0   ;;  %s1494_s24 = smov 0  }
   0x6 LB: > { %s1509_s25 = sadd.s32 4294967295, %s1417_s24   ;;  %s1178_s26 = sadd.s32 4294967294, %s1417_s24   ;;  %s1417_s24 = sphi %s1494_s24, %s1797_s24   ;;  %s1413_s23 = sphi %s1492_s23, %s1796_s23   ;;  %s1409_s22 = sphi %s1490_s22, %s1795_s22   ;;  %s1405_s21 = sphi %s1488_s21, %s1794_s21  }
   0x7   : > { %s1513_s27 = sadd.s32 1, %s1417_s24   ;;  %s294_s28 = sadd.s32 1, %s1413_s23 }
   0x8   : > { %s291_s29 = ssub.s32 %s1417_s24, %s1513_s27  ;;  %p304_p0 = scmp.ne.s32.totalorder %s1413_s23, %s1409_s22 }
   0x9   : > { %p292_p1 = scmp.eq.s32.totalorder %s291_s29, 0  ;;  %p305_p2 = scmp.eq.s32.totalorder %s1509_s25, 1 }
   0xa   : > { %p310_p3 = scmp.ne.s32.totalorder %s1409_s22, %s1405_s21  ;;  %p311_p4 = scmp.eq.s32.totalorder %s1178_s26, 1 }
   0xb   : > { %s1524_s30 = scalar_select %p292_p1, %s1413_s23, %s294_s28  }
   0xc   : > { %p1526_p5 = por %p305_p2, %p304_p0  ;;  %p1530_p6 = por %p311_p4, %p310_p3 }
   0xd   : > { %p1181_p7 = scmp.ge.s32.totalorder %s1417_s24, 1  ;;  %p375_p8 = scmp.lt.s32.totalorder %s1417_s24, 3 }
   0xf   : > { %p376_p9 = pnand %p1181_p7, %p375_p8 }
  0x10   : > { %s421_s15 = smul.u32 (!%p376_p9), 22, %s1509_s25  ;;  %v1419_v0 = vmov (!%p376_p9), 0.0|0.0   ;;  %vm1420_vm0 = vmmov (!%p376_p9), 0   ;;  %v1421_v1 = vmov (!%p376_p9), 0.0   ;;  %vm453_vm1 = vcmask (!%p376_p9), 261120   ;;  %s1792_s0 = sld [smem:[#allocation5_spill]] (!%p376_p9) }
  0x11   : > { %379 = sbr.rel (%p376_p9) target bundleno = 1253 (0x4e5), region = 68  ;;  %1276 = vmatprep.subr.bf16.mxu0 (!%p376_p9), %v1419_v0  ;;  %1279 = vmatprep.subr.bf16.mxu1 (!%p376_p9), %v1419_v0  ;;  %vm631_vm2 = vcmask (!%p376_p9), 1041409   ;;  %vm633_vm3 = vcmask (!%p376_p9), 1042434   ;;  %vm635_vm4 = vcmask (!%p376_p9), 1043459   ;;  %vm637_vm5 = vcmask (!%p376_p9), 1044484   ;;  %p427_p11 = scmp.lt.s32.totalorder (!%p376_p9), %s1509_s25, 1 }
  0x12   : > { %p422_p10 = scmp.lt.s32.totalorder (!%p376_p9), %s421_s15, 43  ;;  %1232 = vmatprep.mubr.msk.f32.mxu0 (!%p376_p9), %vm1420_vm0, %v1421_v1  ;;  %1243 = vmatprep.mubr.msk.f32.mxu1 (!%p376_p9), %vm1420_vm0, %v1421_v1  ;;  %vm639_vm6 = vcmask (!%p376_p9), 1045509   ;;  %vm641_vm7 = vcmask (!%p376_p9), 1046534   ;;  %vm643_vm8 = vcmask (!%p376_p9), 1047559   ;;  %s1793_s1 = sld [smem:[#allocation6_spill]] (!%p376_p9)  ;;  %vm663_vm9 = vcmask (!%p376_p9), 1045504  }
  0x13   : > { %vm659_vm10 = vcmask (!%p376_p9), 179200   ;;  %vm737_vm11 = vcmask (!%p376_p9), 254976   ;;  %vm830_vm12 = vcmask (!%p376_p9), 517120   ;;  %vm889_vm14 = vcmask (!%p376_p9), 523264  }
  0x18   : > { %s1799_s15 = smov (!%p422_p10, %s421_s15), 43 }
  0x19   : > { %s1183_s16 = sshll.u32 %s1799_s15, 3 }
  0x1a   : > { %s1546_s19 = scalar_lea.vmem %s1792_s0, %s1183_s16 }
  0x1b   : > { %v431_v2 = vld [vmem:[%s1546_s19] sm:$0xff]  ;;  %v432_v3 = vld [vmem:[%s1546_s19 + $0x8] sm:$0xff]  ;;  %v433_v4 = vld [vmem:[%s1546_s19 + $0x10] sm:$0xff]  ;;  %s428_s20 = scalar_select %p427_p11, %s1509_s25, 1 }
  0x1c   : > { %v434_v5 = vld [vmem:[%s1546_s19 + $0x18] sm:$0xff]  ;;  %v435_v6 = vld [vmem:[%s1546_s19 + $0x20] sm:$0xff]  ;;  %v436_v7 = vld [vmem:[%s1546_s19 + $0x28] sm:$0xff]  ;;  %v454_v8 = vsel %vm453_vm1, %v431_v2, 0.0  ;;  %v461_v9 = vsel %vm453_vm1, %v432_v3, 0.0  ;;  %v468_v10 = vsel %vm453_vm1, %v433_v4, 0.0 }
  0x1d   : > { %v437_v11 = vld [vmem:[%s1546_s19 + $0x30] sm:$0xff]  ;;  %v438_v12 = vld [vmem:[%s1546_s19 + $0x38] sm:$0xff]  ;;  %v455_v13 = vrot.slane %v454_v8, 4  ;;  %v462_v14 = vrot.slane %v461_v9, 4  ;;  %v469_v15 = vrot.slane %v468_v10, 4  ;;  %v475_v16 = vsel %vm453_vm1, %v434_v5, 0.0 }
  0x1e   : > { %v482_v17 = vsel %vm453_vm1, %v435_v6, 0.0  ;;  %v489_v18 = vsel %vm453_vm1, %v436_v7, 0.0  ;;  %v476_v22 = vrot.slane %v475_v16, 4  ;;  %v496_v25 = vsel %vm453_vm1, %v437_v11, 0.0  ;;  %v439_v47 = vld [vmem:[%s1546_s19 + $0x40] sm:$0xff]  ;;  %v440_v48 = vld [vmem:[%s1546_s19 + $0x48] sm:$0xff] }
  0x1f   : > { %v456_v19 = vadd.f32 %v455_v13, %v454_v8  ;;  %v463_v20 = vadd.f32 %v462_v14, %v461_v9  ;;  %v470_v21 = vadd.f32 %v469_v15, %v468_v10  ;;  %v483_v23 = vrot.slane %v482_v17, 4  ;;  %v441_v49 = vld [vmem:[%s1546_s19 + $0x50] sm:$0xff]  ;;  %v442_v58 = vld [vmem:[%s1546_s19 + $0x58] sm:$0xff]  ;;  %v443_v63 = vld [vmem:[%s1546_s19 + $0x60] sm:$0xff]  ;;  %s1184_s26 = sshll.u32 %s428_s20, 1 }
  0x20   : > { %v490_v24 = vrot.slane %v489_v18, 4  ;;  %v503_v26 = vsel %vm453_vm1, %v438_v12, 0.0  ;;  %v477_v30 = vadd.f32 %v476_v22, %v475_v16  ;;  %v497_v33 = vrot.slane %v496_v25, 4  ;;  %v444_v6 = vld [vmem:[%s1546_s19 + $0x68] sm:$0xff]  ;;  %v445_v11 = vld [vmem:[%s1546_s19 + $0x70] sm:$0xff]  ;;  %v446_v12 = vld [vmem:[%s1546_s19 + $0x78] sm:$0xff]  ;;  %s430_s15 = scalar_lea.vmem %s1793_s1, %s1184_s26 }
  0x21   : > { %v457_v27 = vrot.slane %v456_v19, 2  ;;  %v464_v28 = vrot.slane %v463_v20, 2  ;;  %v471_v29 = vrot.slane %v470_v21, 2  ;;  %v484_v31 = vadd.f32 %v483_v23, %v482_v17 }
  0x22   : > { %v491_v32 = vadd.f32 %v490_v24, %v489_v18  ;;  %v504_v34 = vrot.slane %v503_v26, 4  ;;  %v478_v38 = vrot.slane %v477_v30, 2  ;;  %v498_v41 = vadd.f32 %v497_v33, %v496_v25 }
  0x23   : > { %v458_v35 = vadd.f32 %v457_v27, %v456_v19  ;;  %v465_v36 = vadd.f32 %v464_v28, %v463_v20  ;;  %v472_v37 = vadd.f32 %v471_v29, %v470_v21  ;;  %v485_v39 = vrot.slane %v484_v31, 2 }
  0x24   : > { %v492_v40 = vrot.slane %v491_v32, 2  ;;  %v505_v42 = vadd.f32 %v504_v34, %v503_v26  ;;  %v479_v46 = vadd.f32 %v478_v38, %v477_v30  ;;  %v499_v52 = vrot.slane %v498_v41, 2 }
  0x25   : > { %v459_v43 = vrot.slane %v458_v35, 1  ;;  %v466_v44 = vrot.slane %v465_v36, 1  ;;  %v473_v45 = vrot.slane %v472_v37, 1  ;;  %v486_v50 = vadd.f32 %v485_v39, %v484_v31 }
  0x26   : > { %v493_v51 = vadd.f32 %v492_v40, %v491_v32  ;;  %v506_v53 = vrot.slane %v505_v42, 2  ;;  %v480_v57 = vrot.slane %v479_v46, 1  ;;  %v500_v61 = vadd.f32 %v499_v52, %v498_v41 }
  0x27   : > { %v1567_v54 = vadd.f32 %v459_v43, %v458_v35  ;;  %v1569_v55 = vadd.f32 %v466_v44, %v465_v36  ;;  %v1571_v56 = vadd.f32 %v473_v45, %v472_v37  ;;  %v487_v59 = vrot.slane %v486_v50, 1 }
  0x28   : > { %v494_v60 = vrot.slane %v493_v51, 1  ;;  %v507_v62 = vadd.f32 %v506_v53, %v505_v42  ;;  %v1575_v2 = vadd.f32 %v480_v57, %v479_v46  ;;  %v510_v3 = vsel %vm453_vm1, %v439_v47, 0.0  ;;  %v447_v53 = vld [vmem:[%s1546_s19 + $0x80] sm:$0xff] }
  0x29   : > { %v517_v4 = vsel %vm453_vm1, %v440_v48, 0.0  ;;  %v524_v5 = vsel %vm453_vm1, %v441_v49, 0.0  ;;  %v1581_v7 = vadd.f32 %v487_v59, %v486_v50  ;;  %v501_v9 = vrot.slane %v500_v61, 1 }
  0x2a   : > { %v1583_v8 = vadd.f32 %v494_v60, %v493_v51  ;;  %v508_v10 = vrot.slane %v507_v62, 1  ;;  %v511_v13 = vrot.slane %v510_v3, 4  ;;  %v518_v14 = vrot.slane %v517_v4, 4 }
  0x2b   : > { %v525_v15 = vrot.slane %v524_v5, 4  ;;  %v531_v16 = vsel %vm453_vm1, %v442_v58, 0.0  ;;  %v1588_v17 = vadd.f32 %v501_v9, %v500_v61  ;;  %v538_v20 = vsel %vm453_vm1, %v443_v63, 0.0 }
  0x2c   : > { %v1590_v18 = vadd.f32 %v508_v10, %v507_v62  ;;  %v532_v19 = vrot.slane %v531_v16, 4  ;;  %v512_v21 = vadd.f32 %v511_v13, %v510_v3  ;;  %v519_v22 = vadd.f32 %v518_v14, %v517_v4  ;;  %v448_v4 = vld [vmem:[%s1546_s19 + $0x88] sm:$0xff] }
  0x2d   : > { %v526_v23 = vadd.f32 %v525_v15, %v524_v5  ;;  %v539_v24 = vrot.slane %v538_v20, 4  ;;  %v545_v26 = vsel %vm453_vm1, %v444_v6, 0.0  ;;  %v552_v27 = vsel %vm453_vm1, %v445_v11, 0.0 }
  0x2e   : > { %v533_v25 = vadd.f32 %v532_v19, %v531_v16  ;;  %v559_v28 = vsel %vm453_vm1, %v446_v12, 0.0  ;;  %v513_v29 = vrot.slane %v512_v21, 2  ;;  %v520_v30 = vrot.slane %v519_v22, 2  ;;  %v449_v19 = vld [vmem:[%s1546_s19 + $0x90] sm:$0xff] }
  0x2f   : > { %v527_v31 = vrot.slane %v526_v23, 2  ;;  %v540_v32 = vadd.f32 %v539_v24, %v538_v20  ;;  %v546_v34 = vrot.slane %v545_v26, 4  ;;  %v553_v35 = vrot.slane %v552_v27, 4  ;;  %v450_v20 = vld [vmem:[%s1546_s19 + $0x98] sm:$0xff] }
  0x30   : > { %v534_v33 = vrot.slane %v533_v25, 2  ;;  %v560_v36 = vrot.slane %v559_v28, 4  ;;  %v514_v37 = vadd.f32 %v513_v29, %v512_v21  ;;  %v521_v38 = vadd.f32 %v520_v30, %v519_v22 }
  0x31   : > { %v528_v39 = vadd.f32 %v527_v31, %v526_v23  ;;  %v541_v40 = vrot.slane %v540_v32, 2  ;;  %v547_v42 = vadd.f32 %v546_v34, %v545_v26  ;;  %v554_v43 = vadd.f32 %v553_v35, %v552_v27 }
  0x32   : > { %v535_v41 = vadd.f32 %v534_v33, %v533_v25  ;;  %v561_v44 = vadd.f32 %v560_v36, %v559_v28  ;;  %v515_v45 = vrot.slane %v514_v37, 1  ;;  %v522_v46 = vrot.slane %v521_v38, 1 }
  0x33   : > { %v529_v47 = vrot.slane %v528_v39, 1  ;;  %v542_v48 = vadd.f32 %v541_v40, %v540_v32  ;;  %v548_v50 = vrot.slane %v547_v42, 2  ;;  %v555_v51 = vrot.slane %v554_v43, 2  ;;  %v452_v32 = vld [vmem:[%s1546_s19 + $0xa8] sm:$0xff] }
  0x34   : > { %v536_v49 = vrot.slane %v535_v41, 1  ;;  %v562_v52 = vrot.slane %v561_v44, 2  ;;  %v516_v57 = vadd.f32 %v515_v45, %v514_v37  ;;  %v523_v58 = vadd.f32 %v522_v46, %v521_v38 }
  0x35   : > { %v530_v59 = vadd.f32 %v529_v47, %v528_v39  ;;  %v543_v60 = vrot.slane %v542_v48, 1  ;;  %v549_v62 = vadd.f32 %v548_v50, %v547_v42  ;;  %v556_v63 = vadd.f32 %v555_v51, %v554_v43 }
  0x36   : > { %v537_v61 = vadd.f32 %v536_v49, %v535_v41  ;;  %v563_v3 = vadd.f32 %v562_v52, %v561_v44  ;;  %v632_v6 = vsel %vm631_vm2, %v1569_v55, %v1567_v54  ;;  %v645_v9 = vsel %vm631_vm2, %v523_v58, %v516_v57 }
  0x37   : > { %v544_v5 = vadd.f32 %v543_v60, %v542_v48  ;;  %v566_v10 = vsel %vm453_vm1, %v447_v53, 0.0  ;;  %v550_v11 = vrot.slane %v549_v62, 1  ;;  %v557_v12 = vrot.slane %v556_v63, 1 }
  0x38   : > { %v564_v13 = vrot.slane %v563_v3, 1  ;;  %v634_v14 = vsel %vm633_vm3, %v1571_v56, %v632_v6  ;;  %v646_v16 = vsel %vm633_vm3, %v530_v59, %v645_v9  ;;  %v567_v21 = vrot.slane %v566_v10, 4 }
  0x39   : > { %v636_v15 = vsel %vm635_vm4, %v1575_v2, %v634_v14  ;;  %v573_v54 = vsel %vm453_vm1, %v448_v4, 0.0  ;;  %v551_v55 = vadd.f32 %v550_v11, %v549_v62  ;;  %v558_v22 = vadd.f32 %v557_v12, %v556_v63  ;;  %v451_v2 = vld [vmem:[%s1546_s19 + $0xa0] sm:$0xff]  ;;  %s1200_s19 = sshll.u32 %s1509_s25, 5  ;;  %s1422_s25 = smov [#allocation2]  }
  0x3a   : > { %v565_v23 = vadd.f32 %v564_v13, %v563_v3  ;;  %v638_v24 = vsel %vm637_vm5, %v1581_v7, %v636_v15  ;;  %v647_v25 = vsel %vm635_vm4, %v537_v61, %v646_v16  ;;  %v568_v26 = vadd.f32 %v567_v21, %v566_v10  ;;  %s1733_s0 = scalar_lea.hbm %s1787_s12, %s1200_s19 }
  0x3b   : > { %v640_v56 = vsel %vm639_vm6, %v1583_v8, %v638_v24  ;;  %v574_v27 = vrot.slane %v573_v54, 4  ;;  %v648_v29 = vsel %vm637_vm5, %v544_v5, %v647_v25  ;;  %v580_v30 = vsel %vm453_vm1, %v449_v19, 0.0  ;;  %v608_v19 = vld [vmem:[%s430_s15] sm:$0x3]  ;;  %v745_v24 = vld [vmem:[%s1777_s2 + $0x8] sm:$0xff]  ;;  %s418_s15 = sand.u32 1, %s1409_s22  }
  0x3c   : > { %v642_v28 = vsel %vm641_vm7, %v1588_v17, %v640_v56  ;;  %v587_v31 = vsel %vm453_vm1, %v450_v20, 0.0  ;;  %v649_v8 = vsel %vm639_vm6, %v551_v55, %v648_v29  ;;  %v569_v33 = vrot.slane %v568_v26, 2  ;;  %v746_v56 = vld [vmem:[%s1777_s2 + $0x10] sm:$0xff]  ;;  %s1182_s16 = sshll.u32 %s418_s15, 1  ;;  %s1094_s17 = scalar_lea.sflag [#allocation3], %s418_s15 }
  0x3d   : > { %v644_v7 = vsel %vm643_vm8, %v1590_v18, %v642_v28  ;;  %v575_v34 = vadd.f32 %v574_v27, %v573_v54  ;;  %v650_v35 = vsel %vm641_vm7, %v558_v22, %v649_v8  ;;  %v581_v36 = vrot.slane %v580_v30, 4  ;;  %s420_s20 = scalar_lea.vmem [#allocation2], %s1182_s16  ;;  %s1359_s16 = sshll.u32 %s1422_s25, 4  ;;  %s1360_s16 = int_to_ptr.vmem [resolvable:$false] %s1359_s16 }
  0x3e   : > { %v588_v37 = vrot.slane %v587_v31, 4  ;;  %v594_v17 = vsel %vm453_vm1, %v451_v2, 0.0  ;;  %v651_v38 = vsel %vm643_vm8, %v565_v23, %v650_v35  ;;  %v570_v39 = vadd.f32 %v569_v33, %v568_v26  ;;  %v744_v23 = vld [vmem:[%s1777_s2] sm:$0xff]  ;;  %v747_v2 = vld [vmem:[%s1777_s2 + $0x18] sm:$0xff]  ;;  %v879_v35 = vld [vmem:[%s1781_s6 + $0x28] sm:$0xff]  ;;  %s1107_s26 = sshll.u32 %s420_s20, 4  ;;  %s1735_s26 = int_to_ptr.vmem [resolvable:$true] %s1107_s26 }
  0x3f   : > { %v576_v40 = vrot.slane %v575_v34, 2  ;;  %v595_v41 = vrot.slane %v594_v17, 4  ;;  %v1277_v18 = vpack.c.bf16 %v651_v38, %v644_v7  ;;  %v582_v42 = vadd.f32 %v581_v36, %v580_v30  ;;  %v875_v7 = vld [vmem:[%s1781_s6 + $0x8] sm:$0xff]  ;;  %s1355_s18 = scalar_lea.vmem %s1735_s26, 32  ;;  %s1361_s1 = scalar_lea.vmem %s1360_s16, 64 }
  0x40   : > { %v589_v43 = vadd.f32 %v588_v37, %v587_v31  ;;  %v601_v44 = vsel %vm453_vm1, %v452_v32, 0.0  ;;  %v571_v45 = vrot.slane %v570_v39, 1  ;;  %v1280_v25 = vpack.c.bf16 %v745_v24, %v744_v23  ;;  %v874_v31 = vld [vmem:[%s1781_s6] sm:$0xff]  ;;  %v876_v32 = vld [vmem:[%s1781_s6 + $0x10] sm:$0xff]  ;;  %p1356_p12 = scmp.ne.s32.totalorder %s1735_s26, %s1355_s18  ;;  %p1362_p1 = scmp.lt.s32.totalorder %s1735_s26, %s1360_s16 }
  0x41   : > { %v577_v46 = vadd.f32 %v576_v40, %v575_v34  ;;  %v596_v47 = vadd.f32 %v595_v41, %v594_v17  ;;  %v602_v48 = vrot.slane %v601_v44, 4  ;;  %1278 = vmatpush3.bf16.msra.mxu0 %v1277_v18  ;;  %v583_v49 = vrot.slane %v582_v42, 2  ;;  %v878_v34 = vld [vmem:[%s1781_s6 + $0x20] sm:$0xff]  ;;  %v880_v37 = vld [vmem:[%s1781_s6 + $0x30] sm:$0xff]  ;;  %v881_v17 = vld [vmem:[%s1781_s6 + $0x38] sm:$0xff]  ;;  %p1363_p2 = scmp.lt.s32.totalorder %s1361_s1, %s1355_s18 }
  0x42   : > { %v590_v50 = vrot.slane %v589_v43, 2  ;;  %1230 = vmatprep.subr.mxu0 %v1421_v1  ;;  %v572_v51 = vadd.f32 %v571_v45, %v570_v39  ;;  %1281 = vmatpush3.bf16.msra.mxu1 %v1280_v25  ;;  %v1283_v26 = vpack.c.bf16 %v747_v2, %v746_v56  ;;  %v1286_v8 = vpack.c.bf16 %v875_v7, %v874_v31  ;;  %v1187_v39 = vld [vmem:[%s1778_s3] ss:$0 sm:$0xff]  ;;  %p1357_p13 = pnand %p1356_p12, %p1526_p5 }
  0x43   : > { %v578_v52 = vrot.slane %v577_v46, 1  ;;  %v597_v53 = vrot.slane %v596_v47, 2  ;;  %v603_v57 = vadd.f32 %v602_v48, %v601_v44  ;;  %v584_v58 = vadd.f32 %v583_v49, %v582_v42  ;;  %1282 = vmatprep.subr.bf16.mxu1 %v1419_v0  ;;  %v1192_v23 = vld [vmem:[%s1782_s7] ss:$0 sm:$0xff]  ;;  %p1364_p3 = por %p1363_p2, %p1362_p1 }
  0x44   : > { %v591_v59 = vadd.f32 %v590_v50, %v589_v43  ;;  %v1292_v36 = vpack.c.bf16 %v879_v35, %v878_v34  ;;  %v1295_v38 = vpack.c.bf16 %v881_v17, %v880_v37  ;;  %p1358_p0 = pneg %p1357_p13 }
  0x45   : > { %v579_v60 = vadd.f32 %v578_v52, %v577_v46  ;;  %v598_v61 = vadd.f32 %v597_v53, %v596_v47  ;;  %v604_v62 = vrot.slane %v603_v57, 2  ;;  %v585_v63 = vrot.slane %v584_v58, 1 }
  0x46   : > { %v592_v3 = vrot.slane %v591_v59, 1  ;;  %1284 = vmatpush3.bf16.msra.mxu1 %v1283_v26  ;;  %p1365_p4 = pnand %p1364_p3, %p1358_p0 }
  0x47   : > { %v599_v4 = vrot.slane %v598_v61, 1  ;;  %v605_v5 = vadd.f32 %v604_v62, %v603_v57  ;;  %v652_v6 = vsel %vm631_vm2, %v579_v60, %v572_v51  ;;  %v586_v9 = vadd.f32 %v585_v63, %v584_v58  ;;  %1297 = vmatprep.subr.bf16.mxu1 %v1419_v0 }
  0x48   : > { %v593_v10 = vadd.f32 %v592_v3, %v591_v59 }
  0x49   : > { %v600_v11 = vadd.f32 %v599_v4, %v598_v61  ;;  %v606_v12 = vrot.slane %v605_v5, 1  ;;  %v653_v13 = vsel %vm633_vm3, %v586_v9, %v652_v6  ;;  %v1189_v4 = vld [vmem:[%s1779_s4] ss:$0 sm:$0xff] }
  0x4a   : > { %v654_v15 = vsel %vm635_vm4, %v593_v10, %v653_v13  ;;  %v1190_v6 = vld [vmem:[%s1780_s5] ss:$0 sm:$0xff] }
  0x4b   : > { %v607_v14 = vadd.f32 %v606_v12, %v605_v5  ;;  %v655_v16 = vsel %vm637_vm5, %v600_v11, %v654_v15 }
  0x4d   : > { %v656_v20 = vsel %vm639_vm6, %v607_v14, %v655_v16 }
  0x4e   : > { %1231 = vmatpush3.msk.msra.mxu0 %vm663_vm9, %v656_v20  ;;  %v1008_v20 = vld [vmem:[%s1785_s10 + $0x8] sm:$0xff] }
  0x4f   : > { %1233 = vmatmul.mubr.msk.f32.vlgmr.msra.gmra.mrb[0].mxu0 %vm659_vm10, %v608_v19  ;;  %1285 = vmatprep.subr.bf16.mxu0 %v1419_v0  ;;  %v1007_v19 = vld [vmem:[%s1785_s10] sm:$0xff] }
  0x50   : > { %1262 = vmatprep.mubr.msk.f32.mxu0 %vm1420_vm0, %v1421_v1  ;;  %1287 = vmatpush3.bf16.msra.mxu0 %v1286_v8 }
  0x51   : > { %1288 = vmatprep.subr.bf16.mxu0 %v1419_v0 }
 0x122   : > { %v732_v21 = vpop.f32.mrb[0].mxu0 }
 0x123   : > { %v1234_v54 = vpop.f32.mrb[1].mxu0  ;;  %v736_v55 = vmul.f32 %v732_v21, %v732_v21 }
 0x124   : > { %v1009_v54 = vld [vmem:[%s1785_s10 + $0x10] sm:$0xff] }
 0x125   : > { %v738_v22 = vsel %vm737_vm11, %v736_v55, 0.0  ;;  %v1010_v55 = vld [vmem:[%s1785_s10 + $0x18] sm:$0xff] }
 0x126   : > { %739 = vadd.xlane.f32.xlu0 %v738_v22  ;;  %v1301_v22 = vpack.c.bf16 %v1010_v55, %v1009_v54 }
 0x1b3   : > { %v740_v27 = vpop.xlane.xlu0 %739 }
 0x1b4   : > { %v741_v28 = vmax.f32 %v740_v27, 1e-24 }
 0x1b6   : > { %1345 = vrsqrt.f32 %v741_v28 }
 0x1c0   : > { %v1346_v29 = vpop.eup %1345 }
 0x1c1   : > { %v743_v30 = vmul.f32 %v1346_v29, %v732_v21  ;;  %v1298_v21 = vpack.c.bf16 %v1008_v20, %v1007_v19 }
 0x1c3   : > { %1244 = vmatmul.mubr.msk.f32.vlgmr.msra.gmra.mrb[0].mxu1 %vm453_vm1, %v743_v30 }
 0x1c4   : > { %1273 = vmatprep.mubr.msk.f32.mxu1 %vm1420_vm0, %v1421_v1  ;;  %v877_v1 = vld [vmem:[%s1781_s6 + $0x18] sm:$0xff]  ;;  %1299 = vmatpush3.bf16.msra.mxu1 %v1298_v21  ;;  %vm1091_vm0 = vcmask 123904  }
 0x1c5   : > { %v1289_v33 = vpack.c.bf16 %v877_v1, %v876_v32  ;;  %1300 = vmatprep.subr.bf16.mxu1 %v1419_v0 }
 0x1c7   : > { %1290 = vmatpush3.bf16.msra.mxu0 %v1289_v33 }
 0x1c8   : > { %1291 = vmatprep.subr.bf16.mxu0 %v1419_v0  ;;  %1302 = vmatpush3.bf16.msra.mxu1 %v1301_v22 }
 0x1cb   : > { %1293 = vmatpush3.bf16.msra.mxu0 %v1292_v36 }
 0x1cc   : > { %1294 = vmatprep.subr.bf16.mxu0 %v1419_v0 }
 0x1cf   : > { %1296 = vmatpush3.bf16.msra.mxu0 %v1295_v38 }
 0x296   : > { %v824_v40 = vpop.f32.mrb[0].mxu1 }
 0x297   : > { %v825_v41 = vadd.f32 %v1187_v39, %v824_v40  ;;  %v1245_v18 = vpop.f32.mrb[1].mxu1  ;;  %v1194_v40 = vld [vmem:[%s1783_s8] ss:$0 sm:$0xff] }
 0x298   : > { %v1195_v18 = vld [vmem:[%s1784_s9] ss:$0 sm:$0xff] }
 0x299   : > { %v831_v42 = vsel %vm830_vm12, %v825_v41, 0.0 }
 0x29a   : > { %v832_v43 = vrot.slane %v831_v42, 4 }
 0x29c   : > { %v833_v44 = vadd.f32 %v832_v43, %v831_v42 }
 0x29e   : > { %v834_v45 = vrot.slane %v833_v44, 2 }
 0x2a0   : > { %v835_v46 = vadd.f32 %v834_v45, %v833_v44 }
 0x2a2   : > { %v836_v47 = vrot.slane %v835_v46, 1 }
 0x2a4   : > { %v837_v48 = vadd.f32 %v836_v47, %v835_v46 }
 0x2a6   : > { %v839_v49 = vmul.f32 0.5, %v837_v48 }
 0x2a8   : > { %v840_v50 = vsub.f32 %v825_v41, %v839_v49 }
 0x2aa   : > { %v841_v51 = vmul.f32 %v840_v50, %v840_v50 }
 0x2ac   : > { %v842_v52 = vsel %vm830_vm12, %v841_v51, 0.0 }
 0x2ad   : > { %v843_v53 = vrot.slane %v842_v52, 4 }
 0x2af   : > { %v844_v57 = vadd.f32 %v843_v53, %v842_v52 }
 0x2b1   : > { %v845_v58 = vrot.slane %v844_v57, 2 }
 0x2b3   : > { %v846_v59 = vadd.f32 %v845_v58, %v844_v57 }
 0x2b5   : > { %v847_v60 = vrot.slane %v846_v59, 1 }
 0x2b7   : > { %v848_v61 = vadd.f32 %v847_v60, %v846_v59 }
 0x2b9   : > { %v849_v62 = vmul.f32 0.5, %v848_v61 }
 0x2bb   : > { %v850_v63 = vadd.f32 1e-05, %v849_v62 }
 0x2bd   : > { %1347 = vrsqrt.f32 %v850_v63 }
 0x2c7   : > { %v1348_v3 = vpop.eup %1347 }
 0x2c8   : > { %v852_v5 = vmul.f32 %v1348_v3, %v840_v50  ;;  %v1197_v50 = vld [vmem:[%s1786_s11] ss:$0 sm:$0xff] }
 0x2ca   : > { %v859_v9 = vmul.f32 %v1189_v4, %v852_v5 }
 0x2cc   : > { %v866_v10 = vadd.f32 %v1190_v6, %v859_v9 }
 0x2ce   : > { %v868_v11 = vmul.f32 1.442695, %v866_v10  ;;  %vm867_vm13 = vcmp.gt.f32.partialorder %v866_v10, 0.0 }
 0x2d0   : > { %1349 = vpow2.f32 %v868_v11 }
 0x2da   : > { %v1350_v12 = vpop.eup %1349 }
 0x2db   : > { %v1191_v13 = vadd.f32 -1.0, %v1350_v12 }
 0x2dd   : > { %v871_v14 = vmul.f32 1.6732632, %v1191_v13 }
 0x2df   : > { %v872_v15 = vsel %vm867_vm13, %v866_v10, %v871_v14 }
 0x2e0   : > { %v873_v16 = vmul.f32 1.050701, %v872_v15 }
 0x2e2   : > { %1263 = vmatmul.mubr.msk.f32.vlgmr.msra.gmra.mrb[2].mxu0 %vm889_vm14, %v873_v16 }
 0x3b5   : > { %v959_v24 = vpop.f32.mrb[2].mxu0 }
 0x3b6   : > { %v960_v56 = vadd.f32 %v1192_v23, %v959_v24  ;;  %v1264_v25 = vpop.f32.mrb[3].mxu0 }
 0x3b8   : > { %v965_v2 = vsel %vm737_vm11, %v960_v56, 0.0 }
 0x3b9   : > { %v966_v26 = vrot.slane %v965_v2, 4 }
 0x3bb   : > { %v967_v27 = vadd.f32 %v966_v26, %v965_v2 }
 0x3bd   : > { %v968_v28 = vrot.slane %v967_v27, 2 }
 0x3bf   : > { %v969_v29 = vadd.f32 %v968_v28, %v967_v27 }
 0x3c1   : > { %v970_v30 = vrot.slane %v969_v29, 1 }
 0x3c3   : > { %v971_v31 = vadd.f32 %v970_v30, %v969_v29 }
 0x3c5   : > { %v972_v7 = vmul.f32 0.5, %v971_v31 }
 0x3c7   : > { %v973_v8 = vsub.f32 %v960_v56, %v972_v7 }
 0x3c9   : > { %v974_v0 = vmul.f32 %v973_v8, %v973_v8 }
 0x3cb   : > { %v975_v32 = vsel %vm737_vm11, %v974_v0, 0.0 }
 0x3cc   : > { %v976_v1 = vrot.slane %v975_v32, 4 }
 0x3ce   : > { %v977_v33 = vadd.f32 %v976_v1, %v975_v32 }
 0x3d0   : > { %v978_v34 = vrot.slane %v977_v33, 2 }
 0x3d2   : > { %v979_v35 = vadd.f32 %v978_v34, %v977_v33 }
 0x3d4   : > { %v980_v36 = vrot.slane %v979_v35, 1 }
 0x3d6   : > { %v981_v37 = vadd.f32 %v980_v36, %v979_v35 }
 0x3d8   : > { %v982_v17 = vmul.f32 0.5, %v981_v37 }
 0x3da   : > { %v983_v38 = vadd.f32 1e-05, %v982_v17 }
 0x3dc   : > { %1351 = vrsqrt.f32 %v983_v38 }
 0x3e6   : > { %v1352_v39 = vpop.eup %1351 }
 0x3e7   : > { %v985_v41 = vmul.f32 %v1352_v39, %v973_v8 }
 0x3e9   : > { %v992_v42 = vmul.f32 %v1194_v40, %v985_v41 }
 0x3eb   : > { %v999_v43 = vadd.f32 %v1195_v18, %v992_v42 }
 0x3ed   : > { %v1001_v44 = vmul.f32 1.442695, %v999_v43  ;;  %vm1000_vm15 = vcmp.gt.f32.partialorder %v999_v43, 0.0 }
 0x3ef   : > { %1353 = vpow2.f32 %v1001_v44 }
 0x3f9   : > { %v1354_v45 = vpop.eup %1353 }
 0x3fa   : > { %v1196_v46 = vadd.f32 -1.0, %v1354_v45 }
 0x3fc   : > { %v1004_v47 = vmul.f32 1.6732632, %v1196_v46 }
 0x3fe   : > { %v1005_v48 = vsel %vm1000_vm15, %v999_v43, %v1004_v47 }
 0x3ff   : > { %v1006_v49 = vmul.f32 1.050701, %v1005_v48 }
 0x401   : > { %1274 = vmatmul.mubr.msk.f32.vlgmr.msra.gmra.mrb[2].mxu1 %vm453_vm1, %v1006_v49 }
 0x4d4   : > { %v1087_v51 = vpop.f32.mrb[2].mxu1 }
 0x4d5   : > { %v1088_v52 = vadd.f32 %v1197_v50, %v1087_v51  ;;  %v1275_v53 = vpop.f32.mrb[3].mxu1 }
 0x4d7   : > { %1092 = vst.msk [vmem:[%s420_s20] sm:$0x3] %vm1091_vm0, %v1088_v52 }
 0x4d8   : > { %1368 = shalt.err (!%p1365_p4)
}
 0x4d9   : > { %s1369_s15 = scalar_lea.hbm %s1733_s0, 32  ;;  %s1373_s28 = scalar_lea.hbm %s1787_s12, 64 }
 0x4da   : > { %p1370_p7 = scmp.ne.s32.totalorder %s1733_s0, %s1369_s15  ;;  %p1374_p10 = scmp.lt.u32.totalorder %s1733_s0, %s1787_s12 }
 0x4db   : > { %p1375_p11 = scmp.lt.u32.totalorder %s1373_s28, %s1369_s15  ;;  %p1377_p13 = scmp.lt.u32.totalorder %s1369_s15, %s1733_s0 }
 0x4dc   : > { %p1371_p8 = pnand %p1370_p7, %p1526_p5 }
 0x4dd   : > { %p1376_p12 = por %p1375_p11, %p1374_p10 }
 0x4de   : > { %p1372_p9 = pneg %p1371_p8 }
 0x4df   : > { %p1378_p0 = por %p1377_p13, %p1376_p12 }
 0x4e1   : > { %p1379_p1 = pnand %p1378_p0, %p1372_p9 }
 0x4e3   : > { %1382 = shalt.err (!%p1379_p1)
}
 0x4e4   : > { %1303 = dma.vmem_to_hbm [thread:$0]  (%p1526_p5), %s1735_s26, 32, %s1733_s0, %s1094_s17  }
 0x4e5 PF: > { %p1309_p2 = scmp.ge.s32.totalorder %s1417_s24, 2  ;;  %s1119_s1 = sand.u32 1, %s1405_s21  }
 0x4e6   : > { %s1120_s18 = scalar_lea.sflag [#allocation3], %s1119_s1 }
 0x4e7   : > { %p1306_p3 = pnand %p1309_p2, %p1530_p6 }
 0x4e9   : > { %1400 = dma.done.wait (!%p1306_p3), %s1120_s18, 32  }
 0x4ea   : > { %1402 = vsyncadd (!%p1306_p3), %s1120_s18, 4294967264  ;;  %p22_p4 = scmp.ge.s32.totalorder %s1513_s27, 4   ;;  %s1794_s21 = smov %s1409_s22 }
 0x4eb   : > { %s1795_s22 = smov %s1413_s23  ;;  %s1796_s23 = smov %s1524_s30 }
 0x4ec   : > { %s1797_s24 = smov %s1513_s27  ;;  %24 = sbr.rel (!%p22_p4) target bundleno = 6 (0x6), region = 106 }
 0x4f3   :  { %1125 = vsyncpa [#allocation3], 1 }
 0x4f4   :  { %1127 = vsyncpa [#allocation3 + $0x1], 1 }

</bundles_post_ra>
